<compile_context>
chip_gen: v7x
topology: tpu7x:2x2x1
jax: 0.10.0
libtpu: 0.0.40
codegen_flags: <defaults>
</compile_context>

<pallas_src>
import functools

import jax
import jax.numpy as jnp
from jax.experimental import pallas as pl
from jax.experimental.pallas import tpu as pltpu

_EPS = 1e-5
_HIGH = jax.lax.Precision.HIGHEST   # reference only


def _round_up(a, m):
    return ((a + m - 1) // m) * m


def _padded_tile_bytes(shape, itemsize):
    """VMEM footprint of a buffer with (8,128) padding on the two minor dims."""
    if len(shape) < 2:
        return _round_up(int(jnp.prod(jnp.array(shape))) * itemsize, 512)
    lead = 1
    for d in shape[:-2]:
        lead *= d
    return lead * _round_up(shape[-2], 8) * _round_up(shape[-1], 128) * itemsize


def _device_info():
    """Return (is_v5, multi_tensorcore, physical VMEM bytes per TensorCore)."""
    kind = ""
    try:
        kind = jax.devices()[0].device_kind.lower()
    except Exception:
        pass
    is_v5 = "v5" in kind
    multi_tc = ("v7" in kind) or ("v4" in kind) or ("v3" in kind)
    if "v5" in kind or "v6" in kind:
        vmem_phys = 128 << 20
    elif "v7" in kind:
        vmem_phys = 64 << 20
    else:
        vmem_phys = 64 << 20          # unknown part: be conservative
    return is_v5, multi_tc, vmem_phys


def _pool_blocks(y, Lp, BB):
    """MaxPool1d(kernel=2, stride=2) over the position factor of the (pos, row) lane axis.

    y: (F, L*BB) with lane index = pos*BB + row.  All slices are lane-tile aligned
    (BB is a multiple of 128), so this is pure vld/VALU/vst work, no relayout."""
    parts = [jnp.maximum(y[:, (2 * l) * BB:(2 * l + 1) * BB],
                         y[:, (2 * l + 1) * BB:(2 * l + 2) * BB]) for l in range(Lp)]
    return parts[0] if Lp == 1 else jnp.concatenate(parts, axis=1)


def _onn_kernel(x_ref, w1_ref, w2_ref, wl_ref, sb_ref, o_ref, *,
                BB, P, Cp, K, Q, O1, H, L1, L1p, L2, L2p, stage_f32):
    f32 = jnp.float32
    bf16 = jnp.bfloat16
    st = f32 if stage_f32 else bf16       # v5e has no bf16 VPU -> stage powers in f32

    # per-feature BN(eval) scale/shift and linear bias as column vectors (lane broadcast)
    s1 = sb_ref[:O1, 0:1]
    b1 = sb_ref[:O1, 1:2]
    s2 = sb_ref[:, 2:3]
    b2 = sb_ref[:, 3:4]
    bl = sb_ref[:, 4:5]

    # ---- gather the input block into (Cp, P*BB): lanes = (position, patch-row) ----
    x = jnp.concatenate([x_ref[p] for p in range(P)], axis=1)          # bf16 (Cp, P*BB)
    xs = x.astype(st)
    xp = jnp.concatenate([x,                                            # (Q*Cp, P*BB) bf16
                          (xs * xs).astype(bf16),
                          (xs * xs * xs).astype(bf16)], axis=0)

    # ---- SelfONN conv1: K taps = K matmuls over aligned lane windows ----
    acc1 = jnp.dot(w1_ref[0], xp[:, :L1 * BB], preferred_element_type=f32)
    for j in range(1, K):
        acc1 = acc1 + jnp.dot(w1_ref[j], xp[:, j * BB:j * BB + L1 * BB],
                              preferred_element_type=f32)
    y1 = jnp.tanh(acc1 * s1 + b1)                                       # BN1 + tanh
    y1 = _pool_blocks(y1, L1p, BB).astype(st)                           # (O1, L1p*BB)

    # ---- SelfONN conv2 ----
    xp2 = jnp.concatenate([y1.astype(bf16),
                           (y1 * y1).astype(bf16),
                           (y1 * y1 * y1).astype(bf16)], axis=0)        # (Q*O1, L1p*BB)
    acc2 = jnp.dot(w2_ref[0], xp2[:, :L2 * BB], preferred_element_type=f32)
    for j in range(1, K):
        acc2 = acc2 + jnp.dot(w2_ref[j], xp2[:, j * BB:j * BB + L2 * BB],
                              preferred_element_type=f32)
    y2 = jnp.tanh(acc2 * s2 + b2)                                       # (H, L2*BB)
    y2 = _pool_blocks(y2, L2p, BB).astype(bf16)                         # (H, L2p*BB)

    # ---- torch flatten(1) + Linear, decomposed per pooled position (no relayout) ----
    acc3 = jnp.dot(wl_ref[0], y2[:, :BB], preferred_element_type=f32)
    for l in range(1, L2p):
        acc3 = acc3 + jnp.dot(wl_ref[l], y2[:, l * BB:(l + 1) * BB],
                              preferred_element_type=f32)
    o_ref[...] = (acc3 + bl).astype(o_ref.dtype)                        # (H, BB) lane-dense


def init_params(key, patch_size, num_hiddens, num_channels, q=3, k=3):
    H, O1, C = num_hiddens, num_hiddens // 4, num_channels
    L2p = ((patch_size - k + 1) // 2 - k + 1) // 2
    out_size = L2p * H
    ks = jax.random.split(key, 16)

    def u(kk, shape, fan_in):
        b = 1.0 / jnp.sqrt(jnp.float32(fan_in))
        return jax.random.uniform(kk, shape, jnp.float32, -b, b)

    # SelfONN1d == Conv1d over cat([x, x^2, x^3], channel); weight (out, q*in, k)
    w1 = u(ks[0], (O1, q * C, k), q * C * k)
    b1 = u(ks[1], (O1,), q * C * k)
    w2 = u(ks[2], (H, q * O1, k), q * O1 * k)
    b2 = u(ks[3], (H,), q * O1 * k)
    # BatchNorm1d params (eval mode running stats)
    g1 = 1.0 + 0.1 * jax.random.normal(ks[4], (O1,), jnp.float32)
    be1 = 0.1 * jax.random.normal(ks[5], (O1,), jnp.float32)
    m1 = 0.1 * jax.random.normal(ks[6], (O1,), jnp.float32)
    v1 = 1.0 + 0.1 * jnp.abs(jax.random.normal(ks[7], (O1,), jnp.float32))
    g2 = 1.0 + 0.1 * jax.random.normal(ks[8], (H,), jnp.float32)
    be2 = 0.1 * jax.random.normal(ks[9], (H,), jnp.float32)
    m2 = 0.1 * jax.random.normal(ks[10], (H,), jnp.float32)
    v2 = 1.0 + 0.1 * jnp.abs(jax.random.normal(ks[11], (H,), jnp.float32))
    # Linear(out_size, H)
    wl = u(ks[12], (H, out_size), out_size)
    bl = u(ks[13], (H,), out_size)
    return (w1, b1, g1, be1, m1, v1, w2, b2, g2, be2, m2, v2, wl, bl)


def onn_conv_patch_embedding(x, params, *, patch_size, num_hiddens, block_rows=None):
    B, C, L = x.shape                      # torch NCW layout
    P, H, Q, K = patch_size, num_hiddens, 3, 3
    assert H % 8 == 0 and H >= 8, "num_hiddens must be a multiple of 8"
    O1 = H // 4
    O1p = _round_up(O1, 8)
    Cp = _round_up(C, 8)
    n_patches = L // P
    BP = B * n_patches
    L1 = P - K + 1
    L1p = L1 // 2
    L2 = L1p - K + 1
    L2p = L2 // 2
    assert L1p >= K and L2p >= 1, "patch_size too small for the conv/pool stack"

    (w1, b1, g1, be1, m1, v1, w2, b2, g2, be2, m2, v2, wl, bl) = params

    # ---- device-aware staging dtype, block size and VMEM budget ----
    is_v5, multi_tc, vmem_phys = _device_info()
    stage_f32 = is_v5
    st_b = 4 if stage_f32 else 2

    # padding-aware per-lane (per B'-row) VMEM over-estimate in bytes
    per_lane = (4 * Cp * P                        # bf16 input block, double-buffered
                + (st_b + 2) * Q * Cp * P         # x powers (staging + bf16 matmul copy)
                + (4 + st_b) * O1p * L1           # conv1 f32 acc + tanh
                + st_b * O1p * L1p                # pool1
                + (st_b + 2) * Q * O1p * L1p      # conv2 input powers
                + (4 + st_b) * H * L2             # conv2 f32 acc + tanh
                + 2 * H * L2p                     # pooled bf16 flatten operand
                + 12 * H)                         # linear acc + double-buffered f32 out
    w_bytes = 2 * (_padded_tile_bytes((K, O1p, Q * Cp), 2)
                   + _padded_tile_bytes((K, H, Q * O1p), 2)
                   + _padded_tile_bytes((L2p, H, H), 2)
                   + _padded_tile_bytes((H, 8), 4))

    vmem_cap = int(0.75 * vmem_phys)
    budget = max(vmem_cap - w_bytes - (8 << 20), 16 << 20)
    bb_cap = max(128, min(2048, (budget // max(per_lane, 1)) // 128 * 128))
    BP128 = _round_up(BP, 128)
    if block_rows is not None:
        BB = max(128, _round_up(block_rows, 128))
    elif multi_tc and BP128 >= 256:
        # >=2 programs so both TensorCores get work under "parallel" semantics
        BB = min(bb_cap, max(128, _round_up(-(-BP // 2), 128)))
    else:
        BB = min(bb_cap, BP128)               # single TC: fewest (ideally 1) grid steps
    BP_pad = _round_up(BP, BB)
    grid = (BP_pad // BB,)
    vmem_limit = int(min(vmem_cap, max(32 << 20, per_lane * BB + w_bytes + (8 << 20))))

    # ---- input: torch x.unfold(2,P,P).transpose(1,2).view(-1,C,P), then transpose to
    #      (P, Cp, BP_pad) so each grid step DMAs a lane-dense bf16 block of patch rows ----
    xk = x.reshape(B, C, n_patches, P).transpose(3, 1, 0, 2).reshape(P, C, BP)
    xk = jnp.pad(xk, ((0, 0), (0, Cp - C), (0, BP_pad - BP))).astype(jnp.bfloat16)

    # ---- eval-mode BN folded to per-channel (scale, shift); applied in f32 in-kernel ----
    s1 = g1 / jnp.sqrt(v1 + _EPS); t1 = be1 - m1 * s1
    s2 = g2 / jnp.sqrt(v2 + _EPS); t2 = be2 - m2 * s2
    b1f = s1 * b1 + t1
    b2f = s2 * b2 + t2

    # conv weights (out, q*in, k) -> per-tap (K, out, q*in_padded), zero-padded, bf16
    w1r = jnp.pad(w1.reshape(O1, Q, C, K), ((0, O1p - O1), (0, 0), (0, Cp - C), (0, 0)))
    w1k = jnp.transpose(w1r, (3, 0, 1, 2)).reshape(K, O1p, Q * Cp).astype(jnp.bfloat16)
    w2r = jnp.pad(w2.reshape(H, Q, O1, K), ((0, 0), (0, 0), (0, O1p - O1), (0, 0)))
    w2k = jnp.transpose(w2r, (3, 0, 1, 2)).reshape(K, H, Q * O1p).astype(jnp.bfloat16)
    # linear weight columns are torch flatten(1) order h*L2p + l -> per-position (L2p, H, H)
    wl3 = jnp.transpose(wl.reshape(H, H, L2p), (2, 0, 1)).astype(jnp.bfloat16)

    # pack per-feature scale/shift/bias column vectors into one small f32 tile
    sb = jnp.zeros((H, 8), jnp.float32)
    sb = sb.at[:O1, 0].set(s1).at[:O1, 1].set(b1f)
    sb = sb.at[:, 2].set(s2).at[:, 3].set(b2f).at[:, 4].set(bl)

    kern = functools.partial(_onn_kernel, BB=BB, P=P, Cp=Cp, K=K, Q=Q, O1=O1p, H=H,
                             L1=L1, L1p=L1p, L2=L2, L2p=L2p, stage_f32=stage_f32)

    out = pl.pallas_call(
        kern,
        out_shape=jax.ShapeDtypeStruct((H, BP_pad), jnp.float32),
        grid=grid,
        in_specs=[
            pl.BlockSpec((P, Cp, BB), lambda i: (0, 0, i)),   # patch rows tiled on lanes
            pl.BlockSpec(w1k.shape, lambda i: (0, 0, 0)),     # resident weights
            pl.BlockSpec(w2k.shape, lambda i: (0, 0, 0)),
            pl.BlockSpec(wl3.shape, lambda i: (0, 0, 0)),
            pl.BlockSpec(sb.shape, lambda i: (0, 0)),
        ],
        out_specs=pl.BlockSpec((H, BB), lambda i: (0, i)),
        compiler_params=pltpu.CompilerParams(
            dimension_semantics=("parallel",),
            vmem_limit_bytes=vmem_limit),
    )(xk, w1k, w2k, wl3, sb)

    return out[:, :BP].T.reshape(B, n_patches, H)


def reference(x, params, *, patch_size, num_hiddens):
    """Pure-JAX f32 reference in torch-native NCW layout (HIGHEST precision)."""
    B, C, L = x.shape
    P, H = patch_size, num_hiddens
    n = L // P
    xp = x.reshape(B, C, n, P).transpose(0, 2, 1, 3).reshape(B * n, C, P)
    (w1, b1, g1, be1, m1, v1, w2, b2, g2, be2, m2, v2, wl, bl) = params

    def selfonn(z, w, b):
        zq = jnp.concatenate([z, z ** 2, z ** 3], axis=1)
        y = jax.lax.conv_general_dilated(zq, w, (1,), 'VALID',
                                         dimension_numbers=('NCH', 'OIH', 'NCH'),
                                         precision=_HIGH)
        return y + b[None, :, None]

    def bn(z, g, be, m, v):
        return (z - m[None, :, None]) / jnp.sqrt(v[None, :, None] + _EPS) \
            * g[None, :, None] + be[None, :, None]

    def pool(z):
        Lz = z.shape[-1] // 2
        return z[..., :2 * Lz].reshape(z.shape[0], z.shape[1], Lz, 2).max(-1)

    y = pool(jnp.tanh(bn(selfonn(xp, w1, b1), g1, be1, m1, v1)))
    y = pool(jnp.tanh(bn(selfonn(y, w2, b2), g2, be2, m2, v2)))
    y = y.reshape(y.shape[0], -1)                                  # torch flatten(1) order
    y = jnp.dot(y, wl.T, precision=_HIGH) + bl
    return y.reshape(B, n, H)


if __name__ == "__main__":
    patch_size = 16
    num_hiddens = 32
    num_channels = 4
    batch = 2
    n_patches = 8
    signal_len = n_patches * patch_size                            # 128

    key = jax.random.PRNGKey(0)
    kx, kp = jax.random.split(key)
    x = jax.random.normal(kx, (batch, num_channels, signal_len), jnp.float32)
    params = init_params(kp, patch_size, num_hiddens, num_channels)

    y = onn_conv_patch_embedding(x, params, patch_size=patch_size,
                                 num_hiddens=num_hiddens)
    jax.block_until_ready(y)

    assert y.shape == (batch, n_patches, num_hiddens), y.shape
    y_ref = reference(x, params, patch_size=patch_size, num_hiddens=num_hiddens)
    max_err = float(jnp.max(jnp.abs(y - y_ref)))
    # kernel uses a bf16 input + bf16 MXU operands (f32 accumulate) vs. f32 HIGHEST ref
    assert jnp.allclose(y, y_ref, atol=3e-2, rtol=3e-2), max_err
    print("KERNEL_OK")
</pallas_src>

<mosaic_0001>
module attributes {stable_mosaic.version = 11 : i64} {
  func.func @_onn_kernel(%arg0: i32, %arg1: memref<16x8x128xbf16, #tpu.memory_space<vmem>>, %arg2: memref<3x8x24xbf16, #tpu.memory_space<vmem>>, %arg3: memref<3x32x24xbf16, #tpu.memory_space<vmem>>, %arg4: memref<2x32x32xbf16, #tpu.memory_space<vmem>>, %arg5: memref<32x8xf32, #tpu.memory_space<vmem>>, %arg6: memref<32x128xf32, #tpu.memory_space<vmem>>) attributes {dimension_semantics = [#tpu.dimension_semantics<parallel>], iteration_bounds = array<i64: 1>, scalar_prefetch = 0 : i64, scratch_operands = 0 : i64, tpu.core_type = #tpu.core_type<tc>, window_params = [{transform_indices = @transform_0, window_bounds = array<i64: 16, 8, 128>}, {pipeline_mode = #tpu.pipeline_mode<synchronous>, transform_indices = @transform_1, window_bounds = array<i64: 3, 8, 24>}, {pipeline_mode = #tpu.pipeline_mode<synchronous>, transform_indices = @transform_2, window_bounds = array<i64: 3, 32, 24>}, {pipeline_mode = #tpu.pipeline_mode<synchronous>, transform_indices = @transform_3, window_bounds = array<i64: 2, 32, 32>}, {pipeline_mode = #tpu.pipeline_mode<synchronous>, transform_indices = @transform_4, window_bounds = array<i64: 32, 8>}, {transform_indices = @transform_5, window_bounds = array<i64: 32, 128>}]} {
    %c0 = arith.constant 0 : index
    %c0_0 = arith.constant 0 : index
    %0 = vector.load %arg5[%c0, %c0_0] : memref<32x8xf32, #tpu.memory_space<vmem>>, vector<8x1xf32>
    %c0_1 = arith.constant 0 : index
    %c1 = arith.constant 1 : index
    %1 = vector.load %arg5[%c0_1, %c1] : memref<32x8xf32, #tpu.memory_space<vmem>>, vector<8x1xf32>
    %c0_2 = arith.constant 0 : index
    %c2 = arith.constant 2 : index
    %2 = vector.load %arg5[%c0_2, %c2] : memref<32x8xf32, #tpu.memory_space<vmem>>, vector<32x1xf32>
    %c0_3 = arith.constant 0 : index
    %c3 = arith.constant 3 : index
    %3 = vector.load %arg5[%c0_3, %c3] : memref<32x8xf32, #tpu.memory_space<vmem>>, vector<32x1xf32>
    %c0_4 = arith.constant 0 : index
    %c4 = arith.constant 4 : index
    %4 = vector.load %arg5[%c0_4, %c4] : memref<32x8xf32, #tpu.memory_space<vmem>>, vector<32x1xf32>
    %c0_5 = arith.constant 0 : index
    %c0_6 = arith.constant 0 : index
    %c0_7 = arith.constant 0 : index
    %5 = vector.load %arg1[%c0_5, %c0_6, %c0_7] : memref<16x8x128xbf16, #tpu.memory_space<vmem>>, vector<1x8x128xbf16>
    %6 = vector.shape_cast %5 : vector<1x8x128xbf16> to vector<8x128xbf16>
    %c1_8 = arith.constant 1 : index
    %c0_9 = arith.constant 0 : index
    %c0_10 = arith.constant 0 : index
    %7 = vector.load %arg1[%c1_8, %c0_9, %c0_10] : memref<16x8x128xbf16, #tpu.memory_space<vmem>>, vector<1x8x128xbf16>
    %8 = vector.shape_cast %7 : vector<1x8x128xbf16> to vector<8x128xbf16>
    %c2_11 = arith.constant 2 : index
    %c0_12 = arith.constant 0 : index
    %c0_13 = arith.constant 0 : index
    %9 = vector.load %arg1[%c2_11, %c0_12, %c0_13] : memref<16x8x128xbf16, #tpu.memory_space<vmem>>, vector<1x8x128xbf16>
    %10 = vector.shape_cast %9 : vector<1x8x128xbf16> to vector<8x128xbf16>
    %c3_14 = arith.constant 3 : index
    %c0_15 = arith.constant 0 : index
    %c0_16 = arith.constant 0 : index
    %11 = vector.load %arg1[%c3_14, %c0_15, %c0_16] : memref<16x8x128xbf16, #tpu.memory_space<vmem>>, vector<1x8x128xbf16>
    %12 = vector.shape_cast %11 : vector<1x8x128xbf16> to vector<8x128xbf16>
    %c4_17 = arith.constant 4 : index
    %c0_18 = arith.constant 0 : index
    %c0_19 = arith.constant 0 : index
    %13 = vector.load %arg1[%c4_17, %c0_18, %c0_19] : memref<16x8x128xbf16, #tpu.memory_space<vmem>>, vector<1x8x128xbf16>
    %14 = vector.shape_cast %13 : vector<1x8x128xbf16> to vector<8x128xbf16>
    %c5 = arith.constant 5 : index
    %c0_20 = arith.constant 0 : index
    %c0_21 = arith.constant 0 : index
    %15 = vector.load %arg1[%c5, %c0_20, %c0_21] : memref<16x8x128xbf16, #tpu.memory_space<vmem>>, vector<1x8x128xbf16>
    %16 = vector.shape_cast %15 : vector<1x8x128xbf16> to vector<8x128xbf16>
    %c6 = arith.constant 6 : index
    %c0_22 = arith.constant 0 : index
    %c0_23 = arith.constant 0 : index
    %17 = vector.load %arg1[%c6, %c0_22, %c0_23] : memref<16x8x128xbf16, #tpu.memory_space<vmem>>, vector<1x8x128xbf16>
    %18 = vector.shape_cast %17 : vector<1x8x128xbf16> to vector<8x128xbf16>
    %c7 = arith.constant 7 : index
    %c0_24 = arith.constant 0 : index
    %c0_25 = arith.constant 0 : index
    %19 = vector.load %arg1[%c7, %c0_24, %c0_25] : memref<16x8x128xbf16, #tpu.memory_space<vmem>>, vector<1x8x128xbf16>
    %20 = vector.shape_cast %19 : vector<1x8x128xbf16> to vector<8x128xbf16>
    %c8 = arith.constant 8 : index
    %c0_26 = arith.constant 0 : index
    %c0_27 = arith.constant 0 : index
    %21 = vector.load %arg1[%c8, %c0_26, %c0_27] : memref<16x8x128xbf16, #tpu.memory_space<vmem>>, vector<1x8x128xbf16>
    %22 = vector.shape_cast %21 : vector<1x8x128xbf16> to vector<8x128xbf16>
    %c9 = arith.constant 9 : index
    %c0_28 = arith.constant 0 : index
    %c0_29 = arith.constant 0 : index
    %23 = vector.load %arg1[%c9, %c0_28, %c0_29] : memref<16x8x128xbf16, #tpu.memory_space<vmem>>, vector<1x8x128xbf16>
    %24 = vector.shape_cast %23 : vector<1x8x128xbf16> to vector<8x128xbf16>
    %c10 = arith.constant 10 : index
    %c0_30 = arith.constant 0 : index
    %c0_31 = arith.constant 0 : index
    %25 = vector.load %arg1[%c10, %c0_30, %c0_31] : memref<16x8x128xbf16, #tpu.memory_space<vmem>>, vector<1x8x128xbf16>
    %26 = vector.shape_cast %25 : vector<1x8x128xbf16> to vector<8x128xbf16>
    %c11 = arith.constant 11 : index
    %c0_32 = arith.constant 0 : index
    %c0_33 = arith.constant 0 : index
    %27 = vector.load %arg1[%c11, %c0_32, %c0_33] : memref<16x8x128xbf16, #tpu.memory_space<vmem>>, vector<1x8x128xbf16>
    %28 = vector.shape_cast %27 : vector<1x8x128xbf16> to vector<8x128xbf16>
    %c12 = arith.constant 12 : index
    %c0_34 = arith.constant 0 : index
    %c0_35 = arith.constant 0 : index
    %29 = vector.load %arg1[%c12, %c0_34, %c0_35] : memref<16x8x128xbf16, #tpu.memory_space<vmem>>, vector<1x8x128xbf16>
    %30 = vector.shape_cast %29 : vector<1x8x128xbf16> to vector<8x128xbf16>
    %c13 = arith.constant 13 : index
    %c0_36 = arith.constant 0 : index
    %c0_37 = arith.constant 0 : index
    %31 = vector.load %arg1[%c13, %c0_36, %c0_37] : memref<16x8x128xbf16, #tpu.memory_space<vmem>>, vector<1x8x128xbf16>
    %32 = vector.shape_cast %31 : vector<1x8x128xbf16> to vector<8x128xbf16>
    %c14 = arith.constant 14 : index
    %c0_38 = arith.constant 0 : index
    %c0_39 = arith.constant 0 : index
    %33 = vector.load %arg1[%c14, %c0_38, %c0_39] : memref<16x8x128xbf16, #tpu.memory_space<vmem>>, vector<1x8x128xbf16>
    %34 = vector.shape_cast %33 : vector<1x8x128xbf16> to vector<8x128xbf16>
    %c15 = arith.constant 15 : index
    %c0_40 = arith.constant 0 : index
    %c0_41 = arith.constant 0 : index
    %35 = vector.load %arg1[%c15, %c0_40, %c0_41] : memref<16x8x128xbf16, #tpu.memory_space<vmem>>, vector<1x8x128xbf16>
    %36 = vector.shape_cast %35 : vector<1x8x128xbf16> to vector<8x128xbf16>
    %37 = tpu.concatenate %6, %8, %10, %12, %14, %16, %18, %20, %22, %24, %26, %28, %30, %32, %34, %36 in 1 : vector<8x128xbf16>, vector<8x128xbf16>, vector<8x128xbf16>, vector<8x128xbf16>, vector<8x128xbf16>, vector<8x128xbf16>, vector<8x128xbf16>, vector<8x128xbf16>, vector<8x128xbf16>, vector<8x128xbf16>, vector<8x128xbf16>, vector<8x128xbf16>, vector<8x128xbf16>, vector<8x128xbf16>, vector<8x128xbf16>, vector<8x128xbf16> -> vector<8x2048xbf16>
    %38 = arith.mulf %37, %37 : vector<8x2048xbf16>
    %39 = arith.mulf %37, %37 : vector<8x2048xbf16>
    %40 = arith.mulf %39, %37 : vector<8x2048xbf16>
    %41 = tpu.concatenate %37, %38, %40 in 0 : vector<8x2048xbf16>, vector<8x2048xbf16>, vector<8x2048xbf16> -> vector<24x2048xbf16>
    %c0_42 = arith.constant 0 : index
    %c0_43 = arith.constant 0 : index
    %c0_44 = arith.constant 0 : index
    %42 = vector.load %arg2[%c0_42, %c0_43, %c0_44] : memref<3x8x24xbf16, #tpu.memory_space<vmem>>, vector<1x8x24xbf16>
    %43 = vector.shape_cast %42 : vector<1x8x24xbf16> to vector<8x24xbf16>
    %44 = vector.extract_strided_slice %41 {offsets = [0, 0], sizes = [24, 1792], strides = [1, 1]} : vector<24x2048xbf16> to vector<24x1792xbf16>
    %cst = arith.constant dense<0.000000e+00> : vector<8x1792xf32>
    %45 = tpu.matmul %43, %44, %cst {dimension_numbers = #tpu.dot_dimension_numbers<[1], [0], [0], [1], [0, 0, 1, 1], [], []>} : vector<8x24xbf16>, vector<24x1792xbf16>, vector<8x1792xf32> -> vector<8x1792xf32>
    %c1_45 = arith.constant 1 : index
    %c0_46 = arith.constant 0 : index
    %c0_47 = arith.constant 0 : index
    %46 = vector.load %arg2[%c1_45, %c0_46, %c0_47] : memref<3x8x24xbf16, #tpu.memory_space<vmem>>, vector<1x8x24xbf16>
    %47 = vector.shape_cast %46 : vector<1x8x24xbf16> to vector<8x24xbf16>
    %48 = vector.extract_strided_slice %41 {offsets = [0, 128], sizes = [24, 1792], strides = [1, 1]} : vector<24x2048xbf16> to vector<24x1792xbf16>
    %cst_48 = arith.constant dense<0.000000e+00> : vector<8x1792xf32>
    %49 = tpu.matmul %47, %48, %cst_48 {dimension_numbers = #tpu.dot_dimension_numbers<[1], [0], [0], [1], [0, 0, 1, 1], [], []>} : vector<8x24xbf16>, vector<24x1792xbf16>, vector<8x1792xf32> -> vector<8x1792xf32>
    %50 = arith.addf %45, %49 : vector<8x1792xf32>
    %c2_49 = arith.constant 2 : index
    %c0_50 = arith.constant 0 : index
    %c0_51 = arith.constant 0 : index
    %51 = vector.load %arg2[%c2_49, %c0_50, %c0_51] : memref<3x8x24xbf16, #tpu.memory_space<vmem>>, vector<1x8x24xbf16>
    %52 = vector.shape_cast %51 : vector<1x8x24xbf16> to vector<8x24xbf16>
    %53 = vector.extract_strided_slice %41 {offsets = [0, 256], sizes = [24, 1792], strides = [1, 1]} : vector<24x2048xbf16> to vector<24x1792xbf16>
    %cst_52 = arith.constant dense<0.000000e+00> : vector<8x1792xf32>
    %54 = tpu.matmul %52, %53, %cst_52 {dimension_numbers = #tpu.dot_dimension_numbers<[1], [0], [0], [1], [0, 0, 1, 1], [], []>} : vector<8x24xbf16>, vector<24x1792xbf16>, vector<8x1792xf32> -> vector<8x1792xf32>
    %55 = arith.addf %50, %54 : vector<8x1792xf32>
    %56 = vector.broadcast %0 : vector<8x1xf32> to vector<8x1792xf32>
    %57 = arith.mulf %55, %56 : vector<8x1792xf32>
    %58 = vector.broadcast %1 : vector<8x1xf32> to vector<8x1792xf32>
    %59 = arith.addf %57, %58 : vector<8x1792xf32>
    %60 = math.tanh %59 : vector<8x1792xf32>
    %61 = vector.extract_strided_slice %60 {offsets = [0, 0], sizes = [8, 128], strides = [1, 1]} : vector<8x1792xf32> to vector<8x128xf32>
    %62 = vector.extract_strided_slice %60 {offsets = [0, 128], sizes = [8, 128], strides = [1, 1]} : vector<8x1792xf32> to vector<8x128xf32>
    %63 = arith.maximumf %61, %62 : vector<8x128xf32>
    %64 = vector.extract_strided_slice %60 {offsets = [0, 256], sizes = [8, 128], strides = [1, 1]} : vector<8x1792xf32> to vector<8x128xf32>
    %65 = vector.extract_strided_slice %60 {offsets = [0, 384], sizes = [8, 128], strides = [1, 1]} : vector<8x1792xf32> to vector<8x128xf32>
    %66 = arith.maximumf %64, %65 : vector<8x128xf32>
    %67 = vector.extract_strided_slice %60 {offsets = [0, 512], sizes = [8, 128], strides = [1, 1]} : vector<8x1792xf32> to vector<8x128xf32>
    %68 = vector.extract_strided_slice %60 {offsets = [0, 640], sizes = [8, 128], strides = [1, 1]} : vector<8x1792xf32> to vector<8x128xf32>
    %69 = arith.maximumf %67, %68 : vector<8x128xf32>
    %70 = vector.extract_strided_slice %60 {offsets = [0, 768], sizes = [8, 128], strides = [1, 1]} : vector<8x1792xf32> to vector<8x128xf32>
    %71 = vector.extract_strided_slice %60 {offsets = [0, 896], sizes = [8, 128], strides = [1, 1]} : vector<8x1792xf32> to vector<8x128xf32>
    %72 = arith.maximumf %70, %71 : vector<8x128xf32>
    %73 = vector.extract_strided_slice %60 {offsets = [0, 1024], sizes = [8, 128], strides = [1, 1]} : vector<8x1792xf32> to vector<8x128xf32>
    %74 = vector.extract_strided_slice %60 {offsets = [0, 1152], sizes = [8, 128], strides = [1, 1]} : vector<8x1792xf32> to vector<8x128xf32>
    %75 = arith.maximumf %73, %74 : vector<8x128xf32>
    %76 = vector.extract_strided_slice %60 {offsets = [0, 1280], sizes = [8, 128], strides = [1, 1]} : vector<8x1792xf32> to vector<8x128xf32>
    %77 = vector.extract_strided_slice %60 {offsets = [0, 1408], sizes = [8, 128], strides = [1, 1]} : vector<8x1792xf32> to vector<8x128xf32>
    %78 = arith.maximumf %76, %77 : vector<8x128xf32>
    %79 = vector.extract_strided_slice %60 {offsets = [0, 1536], sizes = [8, 128], strides = [1, 1]} : vector<8x1792xf32> to vector<8x128xf32>
    %80 = vector.extract_strided_slice %60 {offsets = [0, 1664], sizes = [8, 128], strides = [1, 1]} : vector<8x1792xf32> to vector<8x128xf32>
    %81 = arith.maximumf %79, %80 : vector<8x128xf32>
    %82 = tpu.concatenate %63, %66, %69, %72, %75, %78, %81 in 1 : vector<8x128xf32>, vector<8x128xf32>, vector<8x128xf32>, vector<8x128xf32>, vector<8x128xf32>, vector<8x128xf32>, vector<8x128xf32> -> vector<8x896xf32>
    %83 = arith.truncf %82 : vector<8x896xf32> to vector<8x896xbf16>
    %84 = arith.mulf %83, %83 : vector<8x896xbf16>
    %85 = arith.mulf %83, %83 : vector<8x896xbf16>
    %86 = arith.mulf %85, %83 : vector<8x896xbf16>
    %87 = tpu.concatenate %83, %84, %86 in 0 : vector<8x896xbf16>, vector<8x896xbf16>, vector<8x896xbf16> -> vector<24x896xbf16>
    %c0_53 = arith.constant 0 : index
    %c0_54 = arith.constant 0 : index
    %c0_55 = arith.constant 0 : index
    %88 = vector.load %arg3[%c0_53, %c0_54, %c0_55] : memref<3x32x24xbf16, #tpu.memory_space<vmem>>, vector<1x32x24xbf16>
    %89 = vector.shape_cast %88 : vector<1x32x24xbf16> to vector<32x24xbf16>
    %90 = vector.extract_strided_slice %87 {offsets = [0, 0], sizes = [24, 640], strides = [1, 1]} : vector<24x896xbf16> to vector<24x640xbf16>
    %cst_56 = arith.constant dense<0.000000e+00> : vector<32x640xf32>
    %91 = tpu.matmul %89, %90, %cst_56 {dimension_numbers = #tpu.dot_dimension_numbers<[1], [0], [0], [1], [0, 0, 1, 1], [], []>} : vector<32x24xbf16>, vector<24x640xbf16>, vector<32x640xf32> -> vector<32x640xf32>
    %c1_57 = arith.constant 1 : index
    %c0_58 = arith.constant 0 : index
    %c0_59 = arith.constant 0 : index
    %92 = vector.load %arg3[%c1_57, %c0_58, %c0_59] : memref<3x32x24xbf16, #tpu.memory_space<vmem>>, vector<1x32x24xbf16>
    %93 = vector.shape_cast %92 : vector<1x32x24xbf16> to vector<32x24xbf16>
    %94 = vector.extract_strided_slice %87 {offsets = [0, 128], sizes = [24, 640], strides = [1, 1]} : vector<24x896xbf16> to vector<24x640xbf16>
    %cst_60 = arith.constant dense<0.000000e+00> : vector<32x640xf32>
    %95 = tpu.matmul %93, %94, %cst_60 {dimension_numbers = #tpu.dot_dimension_numbers<[1], [0], [0], [1], [0, 0, 1, 1], [], []>} : vector<32x24xbf16>, vector<24x640xbf16>, vector<32x640xf32> -> vector<32x640xf32>
    %96 = arith.addf %91, %95 : vector<32x640xf32>
    %c2_61 = arith.constant 2 : index
    %c0_62 = arith.constant 0 : index
    %c0_63 = arith.constant 0 : index
    %97 = vector.load %arg3[%c2_61, %c0_62, %c0_63] : memref<3x32x24xbf16, #tpu.memory_space<vmem>>, vector<1x32x24xbf16>
    %98 = vector.shape_cast %97 : vector<1x32x24xbf16> to vector<32x24xbf16>
    %99 = vector.extract_strided_slice %87 {offsets = [0, 256], sizes = [24, 640], strides = [1, 1]} : vector<24x896xbf16> to vector<24x640xbf16>
    %cst_64 = arith.constant dense<0.000000e+00> : vector<32x640xf32>
    %100 = tpu.matmul %98, %99, %cst_64 {dimension_numbers = #tpu.dot_dimension_numbers<[1], [0], [0], [1], [0, 0, 1, 1], [], []>} : vector<32x24xbf16>, vector<24x640xbf16>, vector<32x640xf32> -> vector<32x640xf32>
    %101 = arith.addf %96, %100 : vector<32x640xf32>
    %102 = vector.broadcast %2 : vector<32x1xf32> to vector<32x640xf32>
    %103 = arith.mulf %101, %102 : vector<32x640xf32>
    %104 = vector.broadcast %3 : vector<32x1xf32> to vector<32x640xf32>
    %105 = arith.addf %103, %104 : vector<32x640xf32>
    %106 = math.tanh %105 : vector<32x640xf32>
    %107 = vector.extract_strided_slice %106 {offsets = [0, 0], sizes = [32, 128], strides = [1, 1]} : vector<32x640xf32> to vector<32x128xf32>
    %108 = vector.extract_strided_slice %106 {offsets = [0, 128], sizes = [32, 128], strides = [1, 1]} : vector<32x640xf32> to vector<32x128xf32>
    %109 = arith.maximumf %107, %108 : vector<32x128xf32>
    %110 = vector.extract_strided_slice %106 {offsets = [0, 256], sizes = [32, 128], strides = [1, 1]} : vector<32x640xf32> to vector<32x128xf32>
    %111 = vector.extract_strided_slice %106 {offsets = [0, 384], sizes = [32, 128], strides = [1, 1]} : vector<32x640xf32> to vector<32x128xf32>
    %112 = arith.maximumf %110, %111 : vector<32x128xf32>
    %113 = tpu.concatenate %109, %112 in 1 : vector<32x128xf32>, vector<32x128xf32> -> vector<32x256xf32>
    %114 = arith.truncf %113 : vector<32x256xf32> to vector<32x256xbf16>
    %c0_65 = arith.constant 0 : index
    %c0_66 = arith.constant 0 : index
    %c0_67 = arith.constant 0 : index
    %115 = vector.load %arg4[%c0_65, %c0_66, %c0_67] : memref<2x32x32xbf16, #tpu.memory_space<vmem>>, vector<1x32x32xbf16>
    %116 = vector.shape_cast %115 : vector<1x32x32xbf16> to vector<32x32xbf16>
    %117 = vector.extract_strided_slice %114 {offsets = [0, 0], sizes = [32, 128], strides = [1, 1]} : vector<32x256xbf16> to vector<32x128xbf16>
    %cst_68 = arith.constant dense<0.000000e+00> : vector<32x128xf32>
    %118 = tpu.matmul %116, %117, %cst_68 {dimension_numbers = #tpu.dot_dimension_numbers<[1], [0], [0], [1], [0, 0, 1, 1], [], []>} : vector<32x32xbf16>, vector<32x128xbf16>, vector<32x128xf32> -> vector<32x128xf32>
    %c1_69 = arith.constant 1 : index
    %c0_70 = arith.constant 0 : index
    %c0_71 = arith.constant 0 : index
    %119 = vector.load %arg4[%c1_69, %c0_70, %c0_71] : memref<2x32x32xbf16, #tpu.memory_space<vmem>>, vector<1x32x32xbf16>
    %120 = vector.shape_cast %119 : vector<1x32x32xbf16> to vector<32x32xbf16>
    %121 = vector.extract_strided_slice %114 {offsets = [0, 128], sizes = [32, 128], strides = [1, 1]} : vector<32x256xbf16> to vector<32x128xbf16>
    %cst_72 = arith.constant dense<0.000000e+00> : vector<32x128xf32>
    %122 = tpu.matmul %120, %121, %cst_72 {dimension_numbers = #tpu.dot_dimension_numbers<[1], [0], [0], [1], [0, 0, 1, 1], [], []>} : vector<32x32xbf16>, vector<32x128xbf16>, vector<32x128xf32> -> vector<32x128xf32>
    %123 = arith.addf %118, %122 : vector<32x128xf32>
    %124 = vector.broadcast %4 : vector<32x1xf32> to vector<32x128xf32>
    %125 = arith.addf %123, %124 : vector<32x128xf32>
    %c0_73 = arith.constant 0 : index
    %c0_74 = arith.constant 0 : index
    %126 = vector.load %arg6[%c0_73, %c0_74] : memref<32x128xf32, #tpu.memory_space<vmem>>, vector<32x128xf32>
    tpu.vector_store %arg6[%c0_73, %c0_74], %125 {strides = array<i32>} : memref<32x128xf32, #tpu.memory_space<vmem>>, vector<32x128xf32>,
    return
  }
  func.func @transform_0(%arg0: i32) -> (i32, i32, i32) {
    %c0_i32 = arith.constant 0 : i32
    %c0_i32_0 = arith.constant 0 : i32
    %c0_i32_1 = arith.constant 0 : i32
    return %c0_i32, %c0_i32_0, %arg0 : i32, i32, i32
  }
  func.func @transform_1(%arg0: i32) -> (i32, i32, i32) {
    %c0_i32 = arith.constant 0 : i32
    %c0_i32_0 = arith.constant 0 : i32
    %c0_i32_1 = arith.constant 0 : i32
    %c0_i32_2 = arith.constant 0 : i32
    return %c0_i32, %c0_i32_0, %c0_i32_1 : i32, i32, i32
  }
  func.func @transform_2(%arg0: i32) -> (i32, i32, i32) {
    %c0_i32 = arith.constant 0 : i32
    %c0_i32_0 = arith.constant 0 : i32
    %c0_i32_1 = arith.constant 0 : i32
    %c0_i32_2 = arith.constant 0 : i32
    return %c0_i32, %c0_i32_0, %c0_i32_1 : i32, i32, i32
  }
  func.func @transform_3(%arg0: i32) -> (i32, i32, i32) {
    %c0_i32 = arith.constant 0 : i32
    %c0_i32_0 = arith.constant 0 : i32
    %c0_i32_1 = arith.constant 0 : i32
    %c0_i32_2 = arith.constant 0 : i32
    return %c0_i32, %c0_i32_0, %c0_i32_1 : i32, i32, i32
  }
  func.func @transform_4(%arg0: i32) -> (i32, i32) {
    %c0_i32 = arith.constant 0 : i32
    %c0_i32_0 = arith.constant 0 : i32
    %c0_i32_1 = arith.constant 0 : i32
    return %c0_i32, %c0_i32_0 : i32, i32
  }
  func.func @transform_5(%arg0: i32) -> (i32, i32) {
    %c0_i32 = arith.constant 0 : i32
    %c0_i32_0 = arith.constant 0 : i32
    return %c0_i32, %arg0 : i32, i32
  }
}

</mosaic_0001>

<bundles_post_ra>
// kernel: tpu_custom_call.1
= control target key start
LH: loop header
LB: loop body
LE: loop exit
PB: predicated region body
PF: predicated region fallthrough
CT: control target
= control target key end

     0   :  { %10 = vsyncpa [#allocation3], 0  ;;  %s2548_s0 = inlined_call_operand.vmem [shape: bf16[16,8,128], index: 0, kind: input, shape index: {}]   ;;  %s2549_s1 = inlined_call_operand.vmem [shape: bf16[3,8,24], index: 1, kind: input, shape index: {}]   ;;  %s2550_s2 = inlined_call_operand.vmem [shape: bf16[3,32,24], index: 2, kind: input, shape index: {}]   ;;  %s2551_s3 = inlined_call_operand.hbm [shape: bf16[2,32,32], index: 3, kind: input, shape index: {}]   ;;  %s2552_s4 = inlined_call_operand.vmem [shape: f32[32,8], index: 4, kind: input, shape index: {}]   ;;  %s2553_s5 = inlined_call_operand.hbm [shape: f32[32,128], index: 5, kind: output, shape index: {}]  }
   0x1   :  { %11 = vsyncpa [#allocation4], 0  ;;  %s2113_s18 = smov [#allocation2]   ;;  %s2065_s22 = scalar_lea.hbm %s2551_s3, 512 }
   0x2   :  { %s23_s19 = sshll.u32 %s2113_s18, 4  ;;  %p2066_p0 = scmp.ne.s32.totalorder %s2551_s3, %s2065_s22  ;;  %s24_s19 = int_to_ptr.vmem [resolvable:$true] %s23_s19 }
   0x3   :  { %p2069_p1 = scmp.lt.u32.totalorder %s2065_s22, %s2551_s3 }
   0x5   :  { %p2071_p2 = pnand %p2069_p1, %p2066_p0 }
   0x7   :  { %2074 = shalt.err (!%p2071_p2)
}
   0x8   :  { %s2075_s27 = scalar_lea.vmem %s24_s19, 512  ;;  %p2080_p4 = scmp.lt.s32.totalorder %s24_s19, %s24_s19 }
   0x9   :  { %p2076_p3 = scmp.ne.s32.totalorder %s24_s19, %s2075_s27  ;;  %p2081_p5 = scmp.lt.s32.totalorder %s2075_s27, %s2075_s27 }
   0xb   :  { %p2082_p6 = por %p2081_p5, %p2080_p4 }
   0xd   :  { %p2083_p7 = pnand %p2082_p6, %p2076_p3 }
   0xf   :  { %2086 = shalt.err (!%p2083_p7)
}
  0x10   :  { %s2114_s28 = smov 64   ;;  %s2115_s29 = smov 4  }
  0x11   :  { %29 = dma.hbm_to_vmem [thread:$0]  %s2551_s3, 512, %s24_s19, [#allocation3], %s2114_s28, %s2114_s28, %s2115_s29  }
  0x12   :  { %2109 = dma.done.wait [#allocation3], 512  }
  0x13   :  { %2110 = vsyncadd [#allocation3], 4294966784  ;;  %v2116_v0 = vmov 0   ;;  %v1783_v1 = vld [vmem:[%s2548_s0 + $0x8] sm:$0xf]  ;;  %vm123_vm0 = vcmask 1043456  }
  0x14   :  { %255 = vmatprep.mubr.bf16.mxu1 %v2116_v0  ;;  %337 = vmatprep.mubr.bf16.mxu0 %v2116_v0  ;;  %v1787_v2 = vld [vmem:[%s2548_s0 + $0x18] sm:$0xf]  ;;  %v1782_v3 = vld [vmem:[%s2548_s0 + $0x4] sm:$0xf]  ;;  %v69_v4 = vmul.bf16 %v1783_v1, %v1783_v1  ;;  %v1786_v7 = vld [vmem:[%s2548_s0 + $0x14] sm:$0xf] }
  0x15   :  { %1990 = vset.pattern.permute.xlu0 %v2116_v0  ;;  %v73_v5 = vmul.bf16 %v1787_v2, %v1787_v2  ;;  %v68_v6 = vmul.bf16 %v1782_v3, %v1782_v3  ;;  %v1785_v8 = vld [vmem:[%s2548_s0 + $0x10] sm:$0xf]  ;;  %v72_v9 = vmul.bf16 %v1786_v7, %v1786_v7  ;;  %v1791_v19 = vld [vmem:[%s2548_s0 + $0x28] sm:$0xf]  ;;  %v1784_v20 = vld [vmem:[%s2548_s0 + $0xc] sm:$0xf] }
  0x16   :  { %v71_v10 = vmul.bf16 %v1785_v8, %v1785_v8  ;;  %v2184_v11 = vmul.bf16 %v1783_v1, %v69_v4  ;;  %v111_v12 = vrot.slane %v69_v4, 4  ;;  %v1790_v24 = vld [vmem:[%s2548_s0 + $0x24] sm:$0xf]  ;;  %v1789_v25 = vld [vmem:[%s2548_s0 + $0x20] sm:$0xf]  ;;  %vm183_vm1 = vcmask 195584  }
  0x17   :  { %v2186_v13 = vmul.bf16 %v1787_v2, %v73_v5  ;;  %v115_v14 = vrot.slane %v73_v5, 4  ;;  %v110_v15 = vrot.slane %v68_v6, 4  ;;  %v114_v16 = vrot.slane %v72_v9, 4  ;;  %v1788_v28 = vld [vmem:[%s2548_s0 + $0x1c] sm:$0xf]  ;;  %v2222_v29 = vld [vmem:[%s2552_s4] sm:$0xff] }
  0x18   :  { %v2188_v17 = vmul.bf16 %v1782_v3, %v68_v6  ;;  %v2190_v18 = vmul.bf16 %v1786_v7, %v72_v9  ;;  %v2199_v21 = vsel %vm123_vm0, %v1783_v1, %v111_v12  ;;  %v113_v23 = vrot.slane %v71_v10, 4  ;;  %v2228_v32 = vld [vmem:[%s2548_s0] sm:$0xf]  ;;  %989 = vperm.xlu0 %1990, %v2222_v29   ;;  %v2249_v44 = vld [vmem:[%s2549_s1 + $0x4] sm:$0xf] }
  0x19   :  { %v2202_v22 = vsel %vm123_vm0, %v1787_v2, %v115_v14  ;;  %223 = vmatprep.subr.bf16.mxu1 %v2199_v21  ;;  %v130_v26 = vsel %vm123_vm0, %v1782_v3, %v110_v15  ;;  %v2214_v27 = vsel %vm123_vm0, %v1786_v7, %v114_v16  ;;  %v77_v30 = vmul.bf16 %v1791_v19, %v1791_v19  ;;  %v1793_v53 = vld [vmem:[%s2548_s0 + $0x30] sm:$0xf]  ;;  %v1792_v60 = vld [vmem:[%s2548_s0 + $0x2c] sm:$0xf]  ;;  %v180_v9 = vld [vmem:[%s2549_s1] sm:$0xf] }
  0x1a   :  { %305 = vmatprep.subr.bf16.mxu0 %v2202_v22  ;;  %224 = vmatpush1.bf16.msra.mxu1 %v130_v26  ;;  %v70_v31 = vmul.bf16 %v1784_v20, %v1784_v20  ;;  %v188_v33 = vsel %vm123_vm0, %v2188_v17, 0  ;;  %v200_v34 = vsel %vm123_vm0, %v2190_v18, 0  ;;  %v76_v35 = vmul.bf16 %v1790_v24, %v1790_v24 }
  0x1b   :  { %306 = vmatpush1.bf16.msra.mxu0 %v2214_v27  ;;  %1796 = vmatprep.subr.msk.bf16.mxu1 %vm123_vm0, %v2184_v11  ;;  %v75_v36 = vmul.bf16 %v1789_v25, %v1789_v25  ;;  %v2239_v37 = vsel %vm123_vm0, %v1785_v8, %v113_v23  ;;  %v119_v38 = vrot.slane %v77_v30, 4  ;;  %v2242_v40 = vmul.bf16 %v1785_v8, %v71_v10 }
  0x1c   :  { %1800 = vmatprep.subr.msk.bf16.mxu0 %vm123_vm0, %v2186_v13  ;;  %v112_v39 = vrot.slane %v70_v31, 4  ;;  %v2244_v41 = vmul.bf16 %v1791_v19, %v77_v30  ;;  %v118_v42 = vrot.slane %v76_v35, 4  ;;  %v74_v43 = vmul.bf16 %v1788_v28, %v1788_v28 }
  0x1d   :  { %v2252_v45 = vsel %vm123_vm0, %v1791_v19, %v119_v38  ;;  %v2254_v46 = vmul.bf16 %v1784_v20, %v70_v31  ;;  %v2256_v47 = vmul.bf16 %v1790_v24, %v76_v35  ;;  %v117_v50 = vrot.slane %v75_v36, 4  ;;  %v2434_v35 = vld [vmem:[%s2552_s4 + $0x18] sm:$0xff] }
  0x1e   :  { %226 = vmatpush1.bf16.msra.mxu1 %v188_v33  ;;  %v2261_v48 = vsel %vm123_vm0, %v1784_v20, %v112_v39  ;;  %v2264_v49 = vsel %vm123_vm0, %v1790_v24, %v118_v42  ;;  %v67_v51 = vmul.bf16 %v2228_v32, %v2228_v32  ;;  %v2117_v52 = vmov 1   ;;  %v1820_v20 = vld [vmem:[%s2549_s1 + $0x8] sm:$0xf] }
  0x1f   :  { %308 = vmatpush1.bf16.msra.mxu0 %v200_v34  ;;  %264 = vmatprep.subr.bf16.mxu1 %v2239_v37  ;;  %v194_v54 = vsel %vm123_vm0, %v2254_v46, 0  ;;  %v116_v55 = vrot.slane %v74_v43, 4  ;;  %v212_v56 = vsel %vm123_vm0, %v2256_v47, 0  ;;  %v2288_v58 = vsel %vm123_vm0, %v1789_v25, %v117_v50  ;;  %v2425_v34 = vld [vmem:[%s2552_s4 + $0x10] sm:$0xff] }
  0x20   :  { %387 = vmatprep.subr.bf16.mxu0 %v2252_v45  ;;  %1991 = vset.pattern.permute.xlu0 %v2117_v52  ;;  %v109_v57 = vrot.slane %v67_v51, 4  ;;  %v79_v59 = vmul.bf16 %v1793_v53, %v1793_v53  ;;  %v89_v61 = vmul.bf16 %v1789_v25, %v75_v36  ;;  %v2297_v63 = vmul.bf16 %v1788_v28, %v74_v43 }
  0x21   :  { %1797 = vmatmul.mubr.msk.bf16.vlgmr.msra.gmra.mrb[0].mxu1 %vm183_vm1, %v2249_v44  ;;  %1005 = vperm.xlu0 %1991, %v2222_v29   ;;  %v2295_v62 = vsel %vm123_vm0, %v1788_v28, %v116_v55  ;;  %v81_v2 = vmul.bf16 %v67_v51, %v2228_v32  ;;  %v78_v3 = vmul.bf16 %v1792_v60, %v1792_v60  ;;  %v197_v16 = vsel %vm123_vm0, %v2242_v40, 0 }
  0x22   :  { %1801 = vmatmul.mubr.msk.bf16.vlgmr.msra.gmra.mrb[0].mxu0 %vm183_vm1, %v2249_v44  ;;  %265 = vmatpush1.bf16.msra.mxu1 %v2261_v48  ;;  %v126_v1 = vsel %vm123_vm0, %v2228_v32, %v109_v57  ;;  %v121_v4 = vrot.slane %v79_v59, 4  ;;  %v206_v5 = vsel %vm123_vm0, %v2297_v63, 0  ;;  %v2322_v10 = vmul.bf16 %v1793_v53, %v79_v59  ;;  %v2418_v32 = vld [vmem:[%s2552_s4 + $0x8] sm:$0xff] }
  0x23   :  { %388 = vmatpush1.bf16.msra.mxu0 %v2264_v49  ;;  %1798 = vmatprep.subr.msk.bf16.mxu1 %vm123_vm0, %v2242_v40  ;;  %v473_v6 = vsel %vm123_vm0, %v81_v2, 0  ;;  %v120_v7 = vrot.slane %v78_v3, 4  ;;  %v92_v14 = vmul.bf16 %v1792_v60, %v78_v3  ;;  %v209_v19 = vsel %vm123_vm0, %v89_v61, 0 }
  0x24   :  { %1804 = vmatprep.subr.msk.bf16.mxu0 %vm123_vm0, %v2244_v41  ;;  %296 = vmatprep.mubr.bf16.mxu1 %v2116_v0  ;;  %v2317_v8 = vsel %vm123_vm0, %v1793_v53, %v121_v4  ;;  %v221_v25 = vsel %vm123_vm0, %v2322_v10, 0  ;;  %v2118_v31 = vmov 2   ;;  %v2119_v33 = vmov 3  }
  0x25   :  { %419 = vmatprep.mubr.bf16.mxu0 %v2116_v0  ;;  %v170_v12 = vsel %vm123_vm0, %v1792_v60, %v120_v7  ;;  %v218_v15 = vsel %vm123_vm0, %v92_v14, 0  ;;  %1992 = vset.pattern.permute.xlu1 %v2118_v31  ;;  %vm1620_vm2 = vcmask 261120  }
  0x26   :  { %267 = vmatpush1.bf16.msra.mxu1 %v194_v54  ;;  %1994 = vset.pattern.permute.xlu0 %v2119_v33 }
  0x27   :  { %390 = vmatpush1.bf16.msra.mxu0 %v212_v56  ;;  %346 = vmatprep.subr.bf16.mxu1 %v2288_v58 }
  0x28   :  { %475 = vmatprep.subr.bf16.mxu0 %v130_v26  ;;  %1507 = vperm.xlu1 %1992, %v2222_v29  }
  0x29   :  { %1799 = vmatmul.mubr.msk.bf16.vlgmr.msra.gmra.mrb[4].mxu1 %vm183_vm1, %v2249_v44  ;;  %1546 = vperm.xlu0 %1994, %v2418_v32  }
  0x2a   :  { %1805 = vmatmul.mubr.msk.bf16.vlgmr.msra.gmra.mrb[4].mxu0 %vm183_vm1, %v2249_v44  ;;  %347 = vmatpush1.bf16.msra.mxu1 %v2295_v62 }
  0x2b   :  { %476 = vmatpush1.bf16.msra.mxu0 %v126_v1  ;;  %1802 = vmatprep.subr.msk.bf16.mxu1 %vm123_vm0, %v89_v61 }
  0x2c   :  { %1808 = vmatprep.subr.msk.bf16.mxu0 %vm123_vm0, %v2188_v17  ;;  %378 = vmatprep.mubr.bf16.mxu1 %v2116_v0  ;;  %v191_v17 = vsel %vm123_vm0, %v2184_v11, 0  ;;  %v203_v11 = vsel %vm123_vm0, %v2186_v13, 0  ;;  %v215_v13 = vsel %vm123_vm0, %v2244_v41, 0 }
  0x2d   :  { %507 = vmatprep.mubr.bf16.mxu0 %v2116_v0  ;;  %1512 = vperm.xlu1 %1992, %v2418_v32  }
  0x2e   :  { %349 = vmatpush1.bf16.msra.mxu1 %v206_v5  ;;  %1550 = vperm.xlu0 %1994, %v2425_v34  }
  0x2f   :  { %478 = vmatpush1.bf16.msra.mxu0 %v473_v6  ;;  %428 = vmatprep.subr.bf16.mxu1 %v2317_v8 }
  0x30   :  { %557 = vmatprep.subr.bf16.mxu0 %v2214_v27 }
  0x31   :  { %1803 = vmatmul.mubr.msk.bf16.vlgmr.msra.gmra.mrb[8].mxu1 %vm183_vm1, %v2249_v44  ;;  %1993 = vset.pattern.permute.xlu1 %v2119_v33 }
  0x32   :  { %1809 = vmatmul.mubr.msk.bf16.vlgmr.msra.gmra.mrb[8].mxu0 %vm183_vm1, %v180_v9  ;;  %429 = vmatpush1.bf16.msra.mxu1 %v170_v12 }
  0x33   :  { %558 = vmatpush1.bf16.msra.mxu0 %v2239_v37  ;;  %1806 = vmatprep.subr.msk.bf16.mxu1 %vm123_vm0, %v2322_v10 }
  0x34   :  { %1812 = vmatprep.subr.msk.bf16.mxu0 %vm123_vm0, %v2190_v18  ;;  %460 = vmatprep.mubr.bf16.mxu1 %v2116_v0 }
  0x35   :  { %589 = vmatprep.mubr.bf16.mxu0 %v2116_v0  ;;  %1542 = vperm.xlu1 %1993, %v2222_v29  }
  0x36   :  { %431 = vmatpush1.bf16.msra.mxu1 %v218_v15 }
  0x37   :  { %560 = vmatpush1.bf16.msra.mxu0 %v197_v16  ;;  %516 = vmatprep.subr.bf16.mxu1 %v2261_v48 }
  0x38   :  { %639 = vmatprep.subr.bf16.mxu0 %v2264_v49 }
  0x39   :  { %1807 = vmatmul.mubr.msk.bf16.vlgmr.msra.gmra.mrb[12].mxu1 %vm183_vm1, %v2249_v44  ;;  %1995 = vset.pattern.permute.xlu1 %v2118_v31 }
  0x3a   :  { %1813 = vmatmul.mubr.msk.bf16.vlgmr.msra.gmra.mrb[0].mxu0 %vm183_vm1, %v180_v9  ;;  %517 = vmatpush1.bf16.msra.mxu1 %v2199_v21 }
  0x3b   :  { %640 = vmatpush1.bf16.msra.mxu0 %v2288_v58  ;;  %1810 = vmatprep.subr.msk.bf16.mxu1 %vm123_vm0, %v2254_v46 }
  0x3c   :  { %1816 = vmatprep.subr.msk.bf16.mxu0 %vm123_vm0, %v2256_v47  ;;  %548 = vmatprep.mubr.bf16.mxu1 %v2116_v0 }
  0x3d   :  { %671 = vmatprep.mubr.bf16.mxu0 %v2116_v0  ;;  %1517 = vperm.xlu1 %1995, %v2425_v34  }
  0x3e   :  { %519 = vmatpush1.bf16.msra.mxu1 %v191_v17 }
  0x3f   :  { %642 = vmatpush1.bf16.msra.mxu0 %v209_v19  ;;  %598 = vmatprep.subr.bf16.mxu1 %v2295_v62 }
  0x40   :  { %729 = vmatprep.subr.bf16.mxu0 %v2261_v48 }
  0x41   :  { %1811 = vmatmul.mubr.msk.bf16.vlgmr.msra.gmra.mrb[4].mxu1 %vm183_vm1, %v180_v9  ;;  %1522 = vperm.xlu1 %1995, %v2434_v35  }
  0x42   :  { %1817 = vmatmul.mubr.msk.bf16.vlgmr.msra.gmra.mrb[4].mxu0 %vm183_vm1, %v180_v9  ;;  %599 = vmatpush1.bf16.msra.mxu1 %v2202_v22 }
  0x43   :  { %730 = vmatpush1.bf16.msra.mxu0 %v2199_v21  ;;  %1814 = vmatprep.subr.msk.bf16.mxu1 %vm123_vm0, %v2297_v63  ;;  %v1794_v21 = vld [vmem:[%s2548_s0 + $0x34] sm:$0xf] }
  0x44   :  { %1821 = vmatprep.subr.msk.bf16.mxu0 %vm123_vm0, %v2254_v46  ;;  %630 = vmatprep.mubr.bf16.mxu1 %v2116_v0 }
  0x45   :  { %761 = vmatprep.mubr.bf16.mxu0 %v2116_v0  ;;  %1996 = vset.pattern.permute.xlu1 %v2119_v33 }
  0x46   :  { %601 = vmatpush1.bf16.msra.mxu1 %v203_v11  ;;  %1554 = vperm.xlu1 %1996, %v2434_v35  }
  0x47   :  { %732 = vmatpush1.bf16.msra.mxu0 %v191_v17  ;;  %680 = vmatprep.subr.bf16.mxu1 %v170_v12 }
  0x48   :  { %811 = vmatprep.subr.bf16.mxu0 %v2295_v62 }
  0x49   :  { %1815 = vmatmul.mubr.msk.bf16.vlgmr.msra.gmra.mrb[8].mxu1 %vm183_vm1, %v180_v9 }
  0x4a   :  { %1822 = vmatmul.mubr.msk.bf16.vlgmr.msra.gmra.mrb[8].mxu0 %vm183_vm1, %v1820_v20  ;;  %681 = vmatpush1.bf16.msra.mxu1 %v2252_v45 }
  0x4b   :  { %812 = vmatpush1.bf16.msra.mxu0 %v2202_v22  ;;  %1818 = vmatprep.subr.msk.bf16.mxu1 %vm123_vm0, %v92_v14  ;;  %v80_v22 = vmul.bf16 %v1794_v21, %v1794_v21 }
  0x4c   :  { %1825 = vmatprep.subr.msk.bf16.mxu0 %vm123_vm0, %v2297_v63  ;;  %712 = vmatprep.mubr.bf16.mxu1 %v2116_v0 }
  0x4d   :  { %843 = vmatprep.mubr.bf16.mxu0 %v2116_v0  ;;  %v122_v23 = vrot.slane %v80_v22, 4  ;;  %v94_v24 = vmul.bf16 %v1794_v21, %v80_v22 }
  0x4e   :  { %683 = vmatpush1.bf16.msra.mxu1 %v215_v13 }
  0x4f   :  { %814 = vmatpush1.bf16.msra.mxu0 %v203_v11  ;;  %770 = vmatprep.subr.bf16.mxu1 %v2214_v27 }
  0x50   :  { %893 = vmatprep.subr.bf16.mxu0 %v170_v12 }
  0x51   :  { %1819 = vmatmul.mubr.msk.bf16.vlgmr.msra.gmra.mrb[12].mxu1 %vm183_vm1, %v180_v9 }
  0x52   :  { %1826 = vmatmul.mubr.msk.bf16.vlgmr.msra.gmra.mrb[0].mxu0 %vm183_vm1, %v1820_v20  ;;  %771 = vmatpush1.bf16.msra.mxu1 %v2239_v37 }
  0x53   :  { %894 = vmatpush1.bf16.msra.mxu0 %v2252_v45  ;;  %1823 = vmatprep.subr.msk.bf16.mxu1 %vm123_vm0, %v2190_v18  ;;  %v178_v18 = vsel %vm123_vm0, %v1794_v21, %v122_v23 }
  0x54   :  { %1829 = vmatprep.subr.msk.bf16.mxu0 %vm123_vm0, %v92_v14  ;;  %802 = vmatprep.mubr.bf16.mxu1 %v2116_v0 }
  0x55   :  { %925 = vmatprep.mubr.bf16.mxu0 %v2116_v0 }
  0x56   :  { %773 = vmatpush1.bf16.msra.mxu1 %v197_v16 }
  0x57   :  { %896 = vmatpush1.bf16.msra.mxu0 %v215_v13  ;;  %852 = vmatprep.subr.bf16.mxu1 %v2264_v49 }
  0x59   :  { %1824 = vmatmul.mubr.msk.bf16.vlgmr.msra.gmra.mrb[4].mxu1 %vm183_vm1, %v1820_v20 }
  0x5a   :  { %1830 = vmatmul.mubr.msk.bf16.vlgmr.msra.gmra.mrb[4].mxu0 %vm183_vm1, %v1820_v20  ;;  %853 = vmatpush1.bf16.msra.mxu1 %v2288_v58 }
  0x5b   :  { %884 = vmatprep.mubr.bf16.mxu1 %v2116_v0  ;;  %1827 = vmatprep.subr.msk.bf16.mxu1 %vm123_vm0, %v2256_v47 }
  0x5c   :  { %1161 = vmatprep.mubr.bf16.mxu0 %v2116_v0 }
  0x5e   :  { %855 = vmatpush1.bf16.msra.mxu1 %v209_v19 }
  0x5f   :  { %934 = vmatprep.subr.bf16.mxu1 %v178_v18 }
  0x61   :  { %1828 = vmatmul.mubr.msk.bf16.vlgmr.msra.gmra.mrb[8].mxu1 %vm183_vm1, %v1820_v20 }
  0x62   :  { %935 = vmatpush1.bf16.msra.mxu1 %v2317_v8  ;;  %966 = vmatprep.mubr.bf16.mxu1 %v2116_v0 }
  0x63   :  { %1831 = vmatprep.subr.msk.bf16.mxu1 %vm123_vm0, %v94_v24 }
  0x66   :  { %937 = vmatpush1.bf16.msra.mxu1 %v221_v25 }
  0x69   :  { %1832 = vmatmul.mubr.msk.bf16.vlgmr.msra.gmra.mrb[12].mxu1 %vm183_vm1, %v1820_v20 }
  0x6a   :  { %1214 = vmatprep.mubr.bf16.mxu1 %v2116_v0 }
  0x97   :  { %v2438_v36 = vpop.permute.xlu0 %989 }
  0xa0   :  { %v2440_v42 = vpop.permute.xlu0 %1005 }
  0xf4   :  { %v257_v26 = vpop.f32.mrb[0].mxu1 }
  0xf5   :  { %v259_v27 = vpop.f32.mrb[1].mxu1 }
  0xf6   :  { %v261_v28 = vpop.f32.mrb[2].mxu1 }
  0xf7   :  { %v262_v30 = vpop.f32.mrb[3].mxu1 }
 0x11d   :  { %v763_v37 = vpop.f32.mrb[8].mxu0 }
 0x11e   :  { %v1897_v38 = vadd.f32 %v763_v37, %v257_v26  ;;  %v765_v39 = vpop.f32.mrb[9].mxu0 }
 0x11f   :  { %v1898_v40 = vadd.f32 %v765_v39, %v259_v27  ;;  %v767_v41 = vpop.f32.mrb[10].mxu0 }
 0x120   :  { %v768_v43 = vpop.f32.mrb[11].mxu0  ;;  %v992_v44 = vmul.f32 %v1897_v38, %v2438_v36 }
 0x121   :  { %v993_v45 = vmul.f32 %v1898_v40, %v2438_v36 }
 0x122   :  { %v1008_v46 = vadd.f32 %v2440_v42, %v992_v44 }
 0x123   :  { %v1009_v47 = vadd.f32 %v2440_v42, %v993_v45 }
 0x124   :  { %2009 = vtanh.f32 %v1008_v46 }
 0x125   :  { %v845_v48 = vpop.f32.mrb[0].mxu0  ;;  %2011 = vtanh.f32 %v1009_v47 }
 0x126   :  { %v996_v49 = vmul.f32 %v2438_v36, %v845_v48  ;;  %v847_v50 = vpop.f32.mrb[1].mxu0 }
 0x127   :  { %v997_v51 = vmul.f32 %v2438_v36, %v847_v50  ;;  %v849_v52 = vpop.f32.mrb[2].mxu0 }
 0x128   :  { %v1012_v53 = vadd.f32 %v2440_v42, %v996_v49  ;;  %v850_v54 = vpop.f32.mrb[3].mxu0 }
 0x129   :  { %v1013_v55 = vadd.f32 %v2440_v42, %v997_v51 }
 0x12a   :  { %2013 = vtanh.f32 %v1012_v53 }
 0x12b   :  { %2015 = vtanh.f32 %v1013_v55 }
 0x12c   :  { %v804_v56 = vpop.f32.mrb[4].mxu1 }
 0x12d   :  { %v927_v57 = vpop.f32.mrb[4].mxu0  ;;  %v994_v59 = vmul.f32 %v2438_v36, %v804_v56  ;;  %v806_v61 = vpop.f32.mrb[5].mxu1 }
 0x12e   :  { %v2010_v58 = vpop.eup %2009  ;;  %v1000_v60 = vmul.f32 %v2438_v36, %v927_v57  ;;  %v929_v62 = vpop.f32.mrb[5].mxu0  ;;  %v995_v1 = vmul.f32 %v2438_v36, %v806_v61 }
 0x12f   :  { %v2012_v63 = vpop.eup %2011  ;;  %v1001_v2 = vmul.f32 %v2438_v36, %v929_v62  ;;  %v808_v3 = vpop.f32.mrb[6].mxu1  ;;  %v1010_v5 = vadd.f32 %v2440_v42, %v994_v59 }
 0x130   :  { %v931_v4 = vpop.f32.mrb[6].mxu0  ;;  %v1016_v6 = vadd.f32 %v2440_v42, %v1000_v60  ;;  %v809_v7 = vpop.f32.mrb[7].mxu1  ;;  %v1032_v9 = vmax.f32 %v2010_v58, %v2012_v63  ;;  %v1011_v10 = vadd.f32 %v2440_v42, %v995_v1  ;;  %v1999_v63 = vld [vmem:[%s2550_s2 + $0x10] sm:$0xff]  }
 0x131   :  { %v932_v8 = vpop.f32.mrb[7].mxu0  ;;  %v1017_v12 = vadd.f32 %v2440_v42, %v1001_v2  ;;  %2017 = vtanh.f32 %v1010_v5 }
 0x132   :  { %2019 = vtanh.f32 %v1016_v6  ;;  %v1038_v50 = vpack.c.bf16 %v1032_v9, %v1032_v9 }
 0x133   :  { %2021 = vtanh.f32 %v1011_v10 }
 0x134   :  { %v2014_v14 = vpop.eup %2013  ;;  %2023 = vtanh.f32 %v1017_v12  ;;  %v886_v16 = vpop.f32.mrb[8].mxu1  ;;  %v1044_v59 = vmul.bf16 %v1038_v50, %v1038_v50 }
 0x135   :  { %v2016_v15 = vpop.eup %2015  ;;  %v998_v17 = vmul.f32 %v2438_v36, %v886_v16  ;;  %v888_v19 = vpop.f32.mrb[9].mxu1  ;;  %v2000_v16 = vld [vmem:[%s2550_s2 + $0x18] sm:$0xff]  }
 0x136   :  { %v1034_v11 = vmax.f32 %v2014_v14, %v2016_v15  ;;  %v999_v20 = vmul.f32 %v2438_v36, %v888_v19  ;;  %v890_v13 = vpop.f32.mrb[10].mxu1  ;;  %v1062_v1 = vrot.slane %v1044_v59, 4  ;;  %v1050_v10 = vmul.bf16 %v1044_v59, %v1038_v50 }
 0x137   :  { %v1014_v21 = vadd.f32 %v2440_v42, %v998_v17  ;;  %v891_v22 = vpop.f32.mrb[11].mxu1  ;;  %v2001_v13 = vld [vmem:[%s2550_s2] sm:$0xff]  }
 0x138   :  { %v1040_v23 = vpack.c.bf16 %v1034_v11, %v1034_v11  ;;  %v1015_v18 = vadd.f32 %v2440_v42, %v999_v20  ;;  %v1070_v9 = vsel %vm123_vm0, %v1038_v50, %v1062_v1  ;;  %v1252_v15 = vsel %vm123_vm0, %v1050_v10, 0 }
 0x139   :  { %2025 = vtanh.f32 %v1014_v21  ;;  %v2002_v21 = vld [vmem:[%s2550_s2 + $0x8] sm:$0xff]  }
 0x13a   :  { %v1046_v24 = vmul.bf16 %v1040_v23, %v1040_v23  ;;  %2027 = vtanh.f32 %v1015_v18  ;;  %v2003_v18 = vld [vmem:[%s2550_s2 + $0x20] sm:$0xff]  }
 0x13b   :  { %v2018_v25 = vpop.eup %2017 }
 0x13c   :  { %v1064_v26 = vrot.slane %v1046_v24, 4  ;;  %v2020_v27 = vpop.eup %2019  ;;  %v968_v28 = vpop.f32.mrb[12].mxu1  ;;  %v1052_v57 = vmul.bf16 %v1046_v24, %v1040_v23  ;;  %v2004_v24 = vld [vmem:[%s2550_s2 + $0x28] sm:$0xff]   ;;  %s2121_s2 = smov [#allocation5]  }
 0x13d   :  { %v2022_v30 = vpop.eup %2021  ;;  %v1002_v31 = vmul.f32 %v2438_v36, %v968_v28  ;;  %v970_v33 = vpop.f32.mrb[13].mxu1  ;;  %s1770_s6 = sshll.u32 %s2121_s2, 4  ;;  %s1771_s6 = int_to_ptr.vmem [resolvable:$true] %s1770_s6 }
 0x13e   :  { %v2464_v37 = vsel %vm123_vm0, %v1040_v23, %v1064_v26  ;;  %v2024_v38 = vpop.eup %2023  ;;  %v1003_v39 = vmul.f32 %v2438_v36, %v970_v33  ;;  %v972_v40 = vpop.f32.mrb[14].mxu1  ;;  %v1033_v41 = vmax.f32 %v2018_v25, %v2022_v30  ;;  %v1121_v11 = vsel %vm123_vm0, %v1052_v57, 0  ;;  %v2005_v25 = vld [vmem:[#allocation2 + $0x10] sm:$0xff]   ;;  %s2087_s7 = scalar_lea.vmem %s1771_s6, 512  ;;  %p2092_p9 = scmp.lt.s32.totalorder %s1771_s6, %s1771_s6 }
 0x13f   :  { %1129 = vmatprep.subr.bf16.mxu0 %v2464_v37  ;;  %v1018_v43 = vadd.f32 %v2440_v42, %v1002_v31  ;;  %v973_v44 = vpop.f32.mrb[15].mxu1  ;;  %v1036_v45 = vmax.f32 %v2020_v27, %v2024_v38  ;;  %v2120_v26 = vmov 4   ;;  %v1508_v27 = vpop.permute.xlu1 %1507  ;;  %p2088_p8 = scmp.ne.s32.totalorder %s1771_s6, %s2087_s7  ;;  %p2093_p10 = scmp.lt.s32.totalorder %s2087_s7, %s2087_s7 }
 0x140   :  { %v1019_v46 = vadd.f32 %v2440_v42, %v1003_v39  ;;  %v1039_v47 = vpack.c.bf16 %v1033_v41, %v1033_v41  ;;  %1998 = vset.pattern.permute.xlu1 %v2120_v26  ;;  %1997 = vset.pattern.permute.xlu0 %v2120_v26  ;;  %v1547_v40 = vpop.permute.xlu0 %1546 }
 0x141   :  { %2029 = vtanh.f32 %v1018_v43  ;;  %v1042_v48 = vpack.c.bf16 %v1036_v45, %v1036_v45  ;;  %1746 = vperm.xlu1 %1998, %v2418_v32   ;;  %1742 = vperm.xlu0 %1997, %v2222_v29   ;;  %p2094_p11 = por %p2093_p10, %p2092_p9 }
 0x142   :  { %2031 = vtanh.f32 %v1019_v46  ;;  %v1045_v49 = vmul.bf16 %v1039_v47, %v1039_v47 }
 0x143   :  { %v2026_v51 = vpop.eup %2025  ;;  %v1048_v52 = vmul.bf16 %v1042_v48, %v1042_v48  ;;  %v1513_v28 = vpop.permute.xlu1 %1512  ;;  %p2095_p12 = pnand %p2094_p11, %p2088_p8 }
 0x144   :  { %v2028_v53 = vpop.eup %2027  ;;  %v1063_v36 = vrot.slane %v1045_v49, 4  ;;  %v1051_v58 = vmul.bf16 %v1045_v49, %v1039_v47 }
 0x145   :  { %v1066_v54 = vrot.slane %v1048_v52, 4  ;;  %v1035_v55 = vmax.f32 %v2026_v51, %v2028_v53  ;;  %v1054_v6 = vmul.bf16 %v1048_v52, %v1042_v48  ;;  %1750 = vperm.xlu1 %1998, %v2425_v34   ;;  %1754 = vperm.xlu0 %1997, %v2434_v35  }
 0x146   :  { %v1074_v56 = vsel %vm123_vm0, %v1039_v47, %v1063_v36  ;;  %v1118_v62 = vsel %vm123_vm0, %v1051_v58, 0  ;;  %v1551_v47 = vpop.permute.xlu0 %1550 }
 0x147   :  { %1130 = vmatpush1.bf16.msra.mxu0 %v1074_v56  ;;  %v1086_v42 = vsel %vm123_vm0, %v1042_v48, %v1066_v54  ;;  %v1041_v60 = vpack.c.bf16 %v1035_v55, %v1035_v55  ;;  %v1127_v23 = vsel %vm123_vm0, %v1054_v6, 0 }
 0x148   :  { %1182 = vmatprep.subr.bf16.mxu1 %v1086_v42  ;;  %1839 = vmatprep.subr.msk.bf16.mxu0 %vm123_vm0, %v1052_v57 }
 0x149   :  { %v1047_v61 = vmul.bf16 %v1041_v60, %v1041_v60 }
 0x14b   :  { %v2030_v2 = vpop.eup %2029  ;;  %1132 = vmatpush1.bf16.msra.mxu0 %v1118_v62  ;;  %v1065_v3 = vrot.slane %v1047_v61, 4  ;;  %v1053_v7 = vmul.bf16 %v1047_v61, %v1041_v60 }
 0x14c   :  { %v2032_v4 = vpop.eup %2031  ;;  %1254 = vmatprep.subr.bf16.mxu0 %v1074_v56 }
 0x14d   :  { %v1082_v5 = vsel %vm123_vm0, %v1041_v60, %v1065_v3  ;;  %v1037_v8 = vmax.f32 %v2030_v2, %v2032_v4  ;;  %v1124_v14 = vsel %vm123_vm0, %v1053_v7, 0 }
 0x14e   :  { %1840 = vmatmul.mubr.msk.bf16.vlgmr.msra.gmra.mrb[12].mxu0 %vm183_vm1, %v1999_v63  ;;  %1183 = vmatpush1.bf16.msra.mxu1 %v1082_v5 }
 0x14f   :  { %1255 = vmatpush1.bf16.msra.mxu0 %v1070_v9  ;;  %1842 = vmatprep.subr.msk.bf16.mxu1 %vm123_vm0, %v1054_v6  ;;  %v1043_v12 = vpack.c.bf16 %v1037_v8, %v1037_v8 }
 0x150   :  { %1847 = vmatprep.subr.msk.bf16.mxu0 %vm123_vm0, %v1051_v58  ;;  %1171 = vmatprep.mubr.bf16.mxu0 %v2116_v0 }
 0x151   :  { %v1049_v17 = vmul.bf16 %v1043_v12, %v1043_v12 }
 0x152   :  { %1185 = vmatpush1.bf16.msra.mxu1 %v1124_v14 }
 0x153   :  { %1257 = vmatpush1.bf16.msra.mxu0 %v1252_v15  ;;  %1307 = vmatprep.subr.bf16.mxu1 %v1082_v5  ;;  %v1067_v19 = vrot.slane %v1049_v17, 4  ;;  %v1055_v22 = vmul.bf16 %v1049_v17, %v1043_v12 }
 0x154   :  { %1384 = vmatprep.subr.bf16.mxu0 %v1082_v5 }
 0x155   :  { %1843 = vmatmul.mubr.msk.bf16.vlgmr.msra.gmra.mrb[16].mxu1 %vm183_vm1, %v1999_v63  ;;  %v1090_v20 = vsel %vm123_vm0, %v1043_v12, %v1067_v19 }
 0x156   :  { %1841 = vmatmul.mubr.msk.bf16.gmra.mrb[16].mxu0 %vm183_vm1, %v2000_v16  ;;  %1308 = vmatpush1.bf16.msra.mxu1 %v2464_v37 }
 0x157   :  { %1850 = vmatprep.subr.msk.bf16.mxu1 %vm123_vm0, %v1053_v7  ;;  %1224 = vmatprep.mubr.bf16.mxu1 %v2116_v0 }
 0x158   :  { %1286 = vmatprep.mubr.bf16.mxu0 %v2116_v0 }
 0x15a   :  { %1310 = vmatpush1.bf16.msra.mxu1 %v1121_v11 }
 0x15b   :  { %1437 = vmatprep.subr.bf16.mxu1 %v1090_v20 }
 0x15d   :  { %1844 = vmatmul.mubr.msk.bf16.gmra.mrb[20].mxu1 %vm183_vm1, %v2000_v16 }
 0x15e   :  { %1848 = vmatmul.mubr.msk.bf16.vlgmr.msra.gmra.mrb[12].mxu0 %vm183_vm1, %v2001_v13  ;;  %1339 = vmatprep.mubr.bf16.mxu1 %v2116_v0 }
 0x15f   :  { %1385 = vmatpush1.bf16.msra.mxu0 %v2464_v37  ;;  %1296 = vmatprep.mubr.bf16.mxu0 %v2116_v0 }
 0x160   :  { %1859 = vmatprep.subr.msk.bf16.mxu0 %vm123_vm0, %v1053_v7 }
 0x163   :  { %1387 = vmatpush1.bf16.msra.mxu0 %v1121_v11 }
 0x165   :  { %1851 = vmatmul.mubr.msk.bf16.vlgmr.msra.gmra.mrb[16].mxu1 %vm183_vm1, %v2001_v13 }
 0x166   :  { %1849 = vmatmul.mubr.msk.bf16.gmra.mrb[16].mxu0 %vm183_vm1, %v2002_v21  ;;  %1438 = vmatpush1.bf16.msra.mxu1 %v1086_v42 }
 0x167   :  { %1862 = vmatprep.subr.msk.bf16.mxu1 %vm123_vm0, %v1055_v22  ;;  %1349 = vmatprep.mubr.bf16.mxu1 %v2116_v0 }
 0x168   :  { %1416 = vmatprep.mubr.bf16.mxu0 %v2116_v0 }
 0x16a   :  { %1440 = vmatpush1.bf16.msra.mxu1 %v1127_v23 }
 0x16d   :  { %1852 = vmatmul.mubr.msk.bf16.gmra.mrb[20].mxu1 %vm183_vm1, %v2002_v21 }
 0x16e   :  { %1860 = vmatmul.mubr.msk.bf16.vlgmr.msra.gmra.mrb[12].mxu0 %vm183_vm1, %v2003_v18  ;;  %1469 = vmatprep.mubr.bf16.mxu1 %v2116_v0 }
 0x16f   :  { %1426 = vmatprep.mubr.bf16.mxu0 %v2116_v0 }
 0x175   :  { %1863 = vmatmul.mubr.msk.bf16.vlgmr.msra.gmra.mrb[16].mxu1 %vm183_vm1, %v2003_v18 }
 0x176   :  { %1861 = vmatmul.mubr.msk.bf16.gmra.mrb[16].mxu0 %vm183_vm1, %v2004_v24  ;;  %1479 = vmatprep.mubr.bf16.mxu1 %v2116_v0  ;;  %v1543_v0 = vpop.permute.xlu1 %1542 }
 0x177   :  { %1885 = vmatprep.mubr.msk.bf16.mxu0 %vm1620_vm2, %v2005_v25 }
 0x17a   :  { %v1518_v30 = vpop.permute.xlu1 %1517 }
 0x17d   :  { %1864 = vmatmul.mubr.msk.bf16.gmra.mrb[20].mxu1 %vm183_vm1, %v2004_v24 }
 0x17e   :  { %v1523_v34 = vpop.permute.xlu1 %1522 }
 0x182   :  { %v1555_v63 = vpop.permute.xlu1 %1554 }
 0x241   :  { %v1418_v31 = vpop.f32.mrb[12].mxu0 }
 0x242   :  { %v1525_v33 = vmul.f32 %v1508_v27, %v1418_v31  ;;  %v1420_v37 = vpop.f32.mrb[13].mxu0 }
 0x243   :  { %v1526_v38 = vmul.f32 %v1508_v27, %v1420_v37  ;;  %v1422_v39 = vpop.f32.mrb[14].mxu0 }
 0x244   :  { %v1557_v41 = vadd.f32 %v1543_v0, %v1525_v33  ;;  %v1529_v43 = vmul.f32 %v1513_v28, %v1422_v39  ;;  %v1424_v44 = vpop.f32.mrb[15].mxu0 }
 0x245   :  { %v1558_v32 = vadd.f32 %v1543_v0, %v1526_v38  ;;  %v1530_v45 = vmul.f32 %v1513_v28, %v1424_v44 }
 0x246   :  { %2033 = vtanh.f32 %v1557_v41  ;;  %v1561_v29 = vadd.f32 %v1547_v40, %v1529_v43 }
 0x247   :  { %2035 = vtanh.f32 %v1558_v32  ;;  %v1562_v35 = vadd.f32 %v1547_v40, %v1530_v45 }
 0x248   :  { %2037 = vtanh.f32 %v1561_v29  ;;  %v1471_v46 = vpop.f32.mrb[16].mxu1 }
 0x249   :  { %2039 = vtanh.f32 %v1562_v35  ;;  %v1428_v48 = vpop.f32.mrb[16].mxu0  ;;  %v1527_v49 = vmul.f32 %v1508_v27, %v1471_v46  ;;  %v1473_v50 = vpop.f32.mrb[17].mxu1 }
 0x24a   :  { %v1533_v51 = vmul.f32 %v1518_v30, %v1428_v48  ;;  %v1430_v52 = vpop.f32.mrb[17].mxu0  ;;  %v1528_v53 = vmul.f32 %v1508_v27, %v1473_v50  ;;  %v1475_v36 = vpop.f32.mrb[18].mxu1  ;;  %v2006_v48 = vld [vmem:[#allocation2 + $0x18] sm:$0xff]   ;;  %v2008_v50 = vld [vmem:[#allocation2 + $0x8] sm:$0xff]  }
 0x24b   :  { %v1559_v54 = vadd.f32 %v1543_v0, %v1527_v49  ;;  %v1534_v55 = vmul.f32 %v1518_v30, %v1430_v52  ;;  %v1432_v56 = vpop.f32.mrb[18].mxu0  ;;  %v1531_v57 = vmul.f32 %v1513_v28, %v1475_v36  ;;  %v1477_v58 = vpop.f32.mrb[19].mxu1  ;;  %v2007_v49 = vld [vmem:[#allocation2] sm:$0xff]  }
 0x24c   :  { %v1560_v59 = vadd.f32 %v1543_v0, %v1528_v53  ;;  %v1537_v42 = vmul.f32 %v1523_v34, %v1432_v56  ;;  %v1565_v60 = vadd.f32 %v1551_v47, %v1533_v51  ;;  %v1434_v61 = vpop.f32.mrb[19].mxu0  ;;  %v1532_v62 = vmul.f32 %v1513_v28, %v1477_v58  ;;  %v1747_v51 = vpop.permute.xlu1 %1746 }
 0x24d   :  { %2041 = vtanh.f32 %v1559_v54  ;;  %v1563_v1 = vadd.f32 %v1547_v40, %v1531_v57  ;;  %v1566_v2 = vadd.f32 %v1551_v47, %v1534_v55  ;;  %v1538_v3 = vmul.f32 %v1523_v34, %v1434_v61  ;;  %v1743_v52 = vpop.permute.xlu0 %1742 }
 0x24e   :  { %2043 = vtanh.f32 %v1560_v59  ;;  %v1564_v4 = vadd.f32 %v1547_v40, %v1532_v62  ;;  %v1569_v5 = vadd.f32 %v1555_v63, %v1537_v42 }
 0x24f   :  { %2045 = vtanh.f32 %v1563_v1  ;;  %v1570_v7 = vadd.f32 %v1555_v63, %v1538_v3 }
 0x250   :  { %v2034_v6 = vpop.eup %2033  ;;  %2047 = vtanh.f32 %v1565_v60  ;;  %v1481_v8 = vpop.f32.mrb[20].mxu1 }
 0x251   :  { %v2036_v9 = vpop.eup %2035  ;;  %2049 = vtanh.f32 %v1566_v2  ;;  %v1535_v10 = vmul.f32 %v1518_v30, %v1481_v8  ;;  %v1483_v12 = vpop.f32.mrb[21].mxu1 }
 0x252   :  { %v2038_v14 = vpop.eup %2037  ;;  %2051 = vtanh.f32 %v1564_v4  ;;  %v1536_v15 = vmul.f32 %v1518_v30, %v1483_v12  ;;  %v1485_v16 = vpop.f32.mrb[22].mxu1  ;;  %v1589_v17 = vmax.f32 %v2034_v6, %v2036_v9 }
 0x253   :  { %v2040_v19 = vpop.eup %2039  ;;  %2053 = vtanh.f32 %v1569_v5  ;;  %v1567_v11 = vadd.f32 %v1551_v47, %v1535_v10  ;;  %v1539_v20 = vmul.f32 %v1523_v34, %v1485_v16  ;;  %v1487_v13 = vpop.f32.mrb[23].mxu1 }
 0x254   :  { %2055 = vtanh.f32 %v1570_v7  ;;  %v1568_v21 = vadd.f32 %v1551_v47, %v1536_v15  ;;  %v1540_v22 = vmul.f32 %v1523_v34, %v1487_v13  ;;  %v1590_v23 = vmax.f32 %v2038_v14, %v2040_v19  ;;  %v1751_v53 = vpop.permute.xlu1 %1750  ;;  %v1755_v58 = vpop.permute.xlu0 %1754 }
 0x255   :  { %2057 = vtanh.f32 %v1567_v11  ;;  %v1571_v18 = vadd.f32 %v1555_v63, %v1539_v20 }
 0x256   :  { %2059 = vtanh.f32 %v1568_v21  ;;  %v1572_v24 = vadd.f32 %v1555_v63, %v1540_v22  ;;  %v1597_v25 = vpack.c.bf16 %v1590_v23, %v1589_v17 }
 0x257   :  { %v2042_v26 = vpop.eup %2041  ;;  %2061 = vtanh.f32 %v1571_v18 }
 0x258   :  { %v2044_v27 = vpop.eup %2043  ;;  %2063 = vtanh.f32 %v1572_v24 }
 0x259   :  { %v2046_v28 = vpop.eup %2045  ;;  %v1593_v0 = vmax.f32 %v2042_v26, %v2044_v27 }
 0x25a   :  { %v2048_v30 = vpop.eup %2047 }
 0x25b   :  { %v2050_v31 = vpop.eup %2049 }
 0x25c   :  { %v2052_v33 = vpop.eup %2051  ;;  %v1591_v37 = vmax.f32 %v2048_v30, %v2050_v31 }
 0x25d   :  { %v2054_v38 = vpop.eup %2053  ;;  %v1594_v39 = vmax.f32 %v2046_v28, %v2052_v33 }
 0x25e   :  { %v2056_v40 = vpop.eup %2055 }
 0x25f   :  { %v2058_v41 = vpop.eup %2057  ;;  %v1598_v43 = vpack.c.bf16 %v1594_v39, %v1593_v0  ;;  %v1592_v44 = vmax.f32 %v2054_v38, %v2056_v40 }
 0x260   :  { %v2060_v32 = vpop.eup %2059 }
 0x261   :  { %v2062_v45 = vpop.eup %2061  ;;  %1881 = vmatprep.subr.bf16.mxu0 %v1598_v43  ;;  %v1595_v29 = vmax.f32 %v2058_v41, %v2060_v32  ;;  %v1599_v34 = vpack.c.bf16 %v1592_v44, %v1591_v37 }
 0x262   :  { %v2064_v35 = vpop.eup %2063  ;;  %1882 = vmatpush3.bf16.msra.mxu0 %v1598_v43 }
 0x263   :  { %v1596_v46 = vmax.f32 %v2062_v45, %v2064_v35 }
 0x265   :  { %v1600_v47 = vpack.c.bf16 %v1596_v46, %v1595_v29 }
 0x267   :  { %1883 = vmatprep.subr.bf16.mxu0 %v1600_v47 }
 0x268   :  { %1884 = vmatpush3.bf16.msra.mxu0 %v1600_v47 }
 0x269   :  { %1889 = vmatprep.subr.bf16.mxu0 %v1597_v25 }
 0x26b   :  { %1886 = vmatmul.mubr.msk.bf16.vlgmr.msra.gmra.mrb[20].mxu0 %vm1620_vm2, %v2006_v48 }
 0x26c   :  { %1890 = vmatpush3.bf16.msra.mxu0 %v1597_v25  ;;  %1893 = vmatprep.mubr.msk.bf16.mxu0 %vm1620_vm2, %v2007_v49 }
 0x26d   :  { %1891 = vmatprep.subr.bf16.mxu0 %v1599_v34 }
 0x270   :  { %1892 = vmatpush3.bf16.msra.mxu0 %v1599_v34 }
 0x277   :  { %1894 = vmatmul.mubr.msk.bf16.vlgmr.msra.gmra.mrb[20].mxu0 %vm1620_vm2, %v2008_v50 }
 0x34a   :  { %v1895_v36 = vpop.f32.mrb[20].mxu0 }
 0x34b   :  { %v1759_v54 = vadd.f32 %v1895_v36, %v1751_v53  ;;  %v1726_v55 = vpop.f32.mrb[21].mxu0 }
 0x34c   :  { %v1757_v56 = vadd.f32 %v1743_v52, %v1726_v55  ;;  %v1896_v57 = vpop.f32.mrb[22].mxu0 }
 0x34d   :  { %1763 = vst [vmem:[#allocation5 + $0x10] sm:$0xff] %v1759_v54  ;;  %v1760_v59 = vadd.f32 %v1896_v57, %v1755_v58  ;;  %v1729_v42 = vpop.f32.mrb[23].mxu0 }
 0x34e   :  { %1761 = vst [vmem:[#allocation5] sm:$0xff] %v1757_v56  ;;  %v1758_v60 = vadd.f32 %v1747_v51, %v1729_v42 }
 0x34f   :  { %1764 = vst [vmem:[#allocation5 + $0x18] sm:$0xff] %v1760_v59 }
 0x350   :  { %1762 = vst [vmem:[#allocation5 + $0x8] sm:$0xff] %v1758_v60 }
 0x351   :  { %2098 = shalt.err (!%p2095_p12)
}
 0x352   :  { %s2099_s10 = scalar_lea.hbm %s2553_s5, 512 }
 0x353   :  { %p2100_p13 = scmp.ne.s32.totalorder %s2553_s5, %s2099_s10  ;;  %p2103_p0 = scmp.lt.u32.totalorder %s2099_s10, %s2553_s5 }
 0x355   :  { %p2105_p1 = pnand %p2103_p0, %p2100_p13 }
 0x357   :  { %2108 = shalt.err (!%p2105_p1)
}
 0x358   :  { %s2122_s1 = smov 128   ;;  %s2123_s14 = smov 8  }
 0x359   :  { %1776 = dma.vmem_to_hbm [thread:$0]  %s1771_s6, 512, %s2553_s5, [#allocation4], %s2122_s1, %s2122_s1, %s2123_s14  }
 0x35a   :  { %2111 = dma.done.wait [#allocation4], 512  }
 0x35b   :  { %2112 = vsyncadd [#allocation4], 4294966784 }
 0x35c   :  { %1780 = vsyncpa [#allocation3], 1 }
 0x35d   :  { %1781 = vsyncpa [#allocation4], 1 }

</bundles_post_ra>
